<compile_context>
chip_gen: v6e
topology: v6e:2x2x1
jax: 0.10.0
libtpu: 0.0.40
codegen_flags: <defaults>
</compile_context>

<pallas_src>
import functools

import jax
import jax.numpy as jnp
from jax import lax
from jax.experimental import pallas as pl
from jax.experimental.pallas import tpu as pltpu


def _round_up(n, m):
    return ((n + m - 1) // m) * m


def _tpu_generation():
    """Best-effort TPU generation from device_kind (0 if unknown)."""
    try:
        kind = jax.devices()[0].device_kind.lower()
    except Exception:
        return 0
    for g in (7, 6, 5, 4, 3):
        if f"v{g}" in kind:
            return g
    return 0


def _vmem_footprint(c_in, ct, tq, s_pad):
    """Conservative per-core VMEM estimate (bytes) for one grid step."""
    blocks = 2 * (                      # double-buffered pipeline blocks
        (c_in + 1) * s_pad * 4          # x (+ ones row), f32
        + ct * (c_in + 1) * 2           # stacked weight|bias, bf16
        + s_pad * 4                     # additive key-column mask row, f32
        + c_in * tq * 4                 # out tile, f32
        + tq * s_pad * 2                # attention tile, bf16
    )
    scratch = ct * s_pad * 2            # resident q|k|v projections, bf16
    # softmax/matmul temporaries (energy, exp, att f32 + att bf16) and the one-off
    # f32 projection result at qi == 0 (no buffer-reuse assumed -> conservative).
    interm = 14 * tq * s_pad + 4 * ct * s_pad
    return blocks + scratch + interm


def _self_attention_kernel(x_ref, w_ref, mask_ref, gamma_ref, out_ref, att_ref,
                           qkv_ref, *, seq_len, s_pad, tq, cq_pad, cv_pad, c_out,
                           exp_bf16):
    qi = pl.program_id(1)

    # Stacked q|k|v projection (bias folded via the ones row of x): computed once per
    # batch at the first query tile, kept resident in bf16 scratch across qi steps.
    @pl.when(qi == 0)
    def _():
        x_bf = x_ref[0].astype(jnp.bfloat16)                          # (C+1, s_pad)
        qkv = jnp.dot(w_ref[...], x_bf,
                      preferred_element_type=jnp.float32)             # (CT, s_pad)
        qkv_ref[...] = qkv.astype(jnp.bfloat16)

    q0 = pl.multiple_of(qi * tq, 128)
    q_tile = qkv_ref[0:cq_pad, pl.ds(q0, tq)]                         # (cq_pad, tq)  bf16
    k = qkv_ref[cq_pad:2 * cq_pad, :]                                 # (cq_pad, s_pad)
    v = qkv_ref[2 * cq_pad:2 * cq_pad + cv_pad, :]                    # (cv_pad, s_pad)

    # energy[i, j] = sum_c q[c, q0+i] * k[c, j].  Only the small (cq_pad, tq) q tile
    # is transposed by the lowering; k feeds the MXU canonically.
    energy = lax.dot_general(q_tile, k, (((0,), (0,)), ((), ())),
                             preferred_element_type=jnp.float32)      # (tq, s_pad) f32

    if seq_len != s_pad:
        energy = energy + mask_ref[...]                               # additive col mask

    # Row softmax (matches nn.Softmax(dim=-1)); exp in bf16 on chips with a bf16 EUP.
    m = jnp.max(energy, axis=-1, keepdims=True)
    z = energy - m
    if exp_bf16:
        e = jnp.exp(z.astype(jnp.bfloat16)).astype(jnp.float32)
    else:
        e = jnp.exp(z)
    att = e * pl.reciprocal(jnp.sum(e, axis=-1, keepdims=True), approx=True)
    att_bf = att.astype(jnp.bfloat16)
    att_ref[0] = att_bf                                               # bf16 HBM write

    # out_tile^T[i, c] = sum_j att[i, j] * v[c, j]  ->  att @ v^T: only the C-wide v
    # and the small (tq, C) result are transposed, never an S-wide matrix.
    out_t = lax.dot_general(att_bf, v, (((1,), (1,)), ((), ())),
                            preferred_element_type=jnp.float32)       # (tq, cv_pad) f32

    gamma = gamma_ref[0, 0]
    x_res = x_ref[0, :c_out, pl.ds(q0, tq)]                           # (C, tq) f32
    out_ref[0] = (gamma * out_t[:, :c_out].T + x_res).astype(out_ref.dtype)


def self_attention(x, wq, bq, wk, bk, wv, bv, gamma):
    """x: (B, C, S); returns (out (B, C, S) f32, attention (B, S, S) bf16)."""
    x = x.astype(jnp.float32)
    B, C, S = x.shape
    Cq = wq.shape[0]
    gen = _tpu_generation()

    # q/k/v segment row padding to multiples of 16 (bf16 sublane packing).
    cq_pad = _round_up(max(Cq, 1), 16)
    cv_pad = _round_up(C, 16)
    ct = 2 * cq_pad + cv_pad

    # Generation-aware VMEM budget (leave headroom on v7x's 64 MiB, use the room on
    # v5e/v6e's 128 MiB).
    if gen >= 7:
        cap = 52 << 20
    elif gen in (4, 5, 6):
        cap = 100 << 20
    else:
        cap = 64 << 20

    # Query-tile size: lane-dense (multiple of 128), divides s_pad, fits the budget.
    s_pad = _round_up(S, 128)
    max_tq = 512 if gen in (4, 5, 6) else 256
    if s_pad <= max_tq:
        tq = s_pad
    else:
        tq = 128
        for cand in (512, 384, 256, 128):
            if (cand <= max_tq and s_pad % cand == 0
                    and _vmem_footprint(C, ct, cand, s_pad) <= cap):
                tq = cand
                break
    n_q = s_pad // tq
    footprint = _vmem_footprint(C, ct, tq, s_pad)
    vmem_limit = int(min(max(int(footprint * 1.3) + (2 << 20), 16 << 20), cap))

    # Stack (weight | bias) rows for q/k/v; padded rows are zero so padded q/k channels
    # contribute nothing to energy and padded v rows are sliced away in the kernel.
    def pad_rows(a, rows):
        return jnp.pad(a, ((0, rows - a.shape[0]), (0, 0)))

    wb_q = pad_rows(jnp.concatenate([wq, bq], axis=1), cq_pad)        # (cq_pad, C+1)
    wb_k = pad_rows(jnp.concatenate([wk, bk], axis=1), cq_pad)
    wb_v = pad_rows(jnp.concatenate([wv, bv], axis=1), cv_pad)
    w_stacked = jnp.concatenate([wb_q, wb_k, wb_v], axis=0).astype(jnp.bfloat16)

    # Append the ones row (bias fold) and pad the sequence (lane) axis.
    ones_row = jnp.ones((B, 1, S), jnp.float32)
    x_aug = jnp.concatenate([x, ones_row], axis=1)                    # (B, C+1, S)
    x_aug = jnp.pad(x_aug, ((0, 0), (0, 0), (0, s_pad - S)))          # (B, C+1, s_pad)

    # Additive key-column mask: 0 for valid columns, -1e30 for padded ones.
    col = jnp.arange(s_pad, dtype=jnp.int32)[None, :]
    mask_row = jnp.where(col < S, 0.0, -1e30).astype(jnp.float32)     # (1, s_pad)

    gamma_in = jnp.asarray(gamma, jnp.float32).reshape(1, 1)

    kernel = functools.partial(
        _self_attention_kernel, seq_len=S, s_pad=s_pad, tq=tq,
        cq_pad=cq_pad, cv_pad=cv_pad, c_out=C, exp_bf16=(gen >= 6))

    out_p, att_p = pl.pallas_call(
        kernel,
        out_shape=(
            jax.ShapeDtypeStruct((B, C, s_pad), jnp.float32),
            jax.ShapeDtypeStruct((B, s_pad, s_pad), jnp.bfloat16),
        ),
        grid_spec=pltpu.PrefetchScalarGridSpec(
            num_scalar_prefetch=0,
            grid=(B, n_q),
            in_specs=[
                pl.BlockSpec((1, C + 1, s_pad), lambda b, q: (b, 0, 0)),   # x (+ ones row)
                pl.BlockSpec((ct, C + 1), lambda b, q: (0, 0)),            # stacked W|b
                pl.BlockSpec((1, s_pad), lambda b, q: (0, 0)),             # additive mask
                pl.BlockSpec(memory_space=pltpu.MemorySpace.SMEM),         # gamma scalar
            ],
            out_specs=[
                pl.BlockSpec((1, C, tq), lambda b, q: (b, 0, q)),          # out columns
                pl.BlockSpec((1, tq, s_pad), lambda b, q: (b, q, 0)),      # attention rows
            ],
            scratch_shapes=[pltpu.VMEM((ct, s_pad), jnp.bfloat16)],        # resident q|k|v
        ),
        compiler_params=pltpu.CompilerParams(
            dimension_semantics=("parallel", "arbitrary"),
            vmem_limit_bytes=vmem_limit),
    )(x_aug, w_stacked, mask_row, gamma_in)

    # Strip sequence padding; attention is returned in bf16 (halves HBM traffic).
    return out_p[:, :, :S], att_p[:, :S, :S]


def _reference(x, wq, bq, wk, bk, wv, bv, gamma):
    q = jnp.einsum('oc,bcs->bos', wq, x) + bq[None]          # (B, Cq, S)
    k = jnp.einsum('oc,bcs->bos', wk, x) + bk[None]          # (B, Cq, S)
    v = jnp.einsum('oc,bcs->bos', wv, x) + bv[None]          # (B, C,  S)
    energy = jnp.einsum('bci,bcj->bij', q, k)                # (B, S, S)
    att = jax.nn.softmax(energy, axis=-1)
    out = jnp.einsum('bcj,bij->bci', v, att)                 # (B, C, S)
    out = gamma[0, 0] * out + x
    return out, att


if __name__ == "__main__":
    # SelfAttention(in_dim=C): query/key conv -> C//8 channels, value conv -> C.
    B, C, S = 2, 32, 16
    Cq = C // 8

    key = jax.random.PRNGKey(0)
    kx, kq, kbq, kk, kbk, kv, kbv = jax.random.split(key, 7)

    x = jax.random.normal(kx, (B, C, S), dtype=jnp.float32)
    wq = jax.random.normal(kq, (Cq, C), dtype=jnp.float32) * 0.1
    bq = jax.random.normal(kbq, (Cq, 1), dtype=jnp.float32) * 0.1
    wk = jax.random.normal(kk, (Cq, C), dtype=jnp.float32) * 0.1
    bk = jax.random.normal(kbk, (Cq, 1), dtype=jnp.float32) * 0.1
    wv = jax.random.normal(kv, (C, C), dtype=jnp.float32) * 0.1
    bv = jax.random.normal(kbv, (C, 1), dtype=jnp.float32) * 0.1
    # Module __init__ sets gamma = 0; use a non-zero value here so the attention
    # output path is actually exercised.
    gamma = jnp.full((1, 1), 0.5, dtype=jnp.float32)

    out, att = self_attention(x, wq, bq, wk, bk, wv, bv, gamma)
    out = jax.block_until_ready(out)
    att = jax.block_until_ready(att)

    out_ref, att_ref = _reference(x, wq, bq, wk, bk, wv, bv, gamma)
    # bf16 matmul operands / bf16 attention output (f32 accumulation) + approx
    # reciprocal => relaxed tolerance.
    assert out.shape == out_ref.shape and att.shape == att_ref.shape
    assert jnp.allclose(out, out_ref, atol=2e-2, rtol=2e-2)
    assert jnp.allclose(att.astype(jnp.float32), att_ref, atol=2e-2, rtol=2e-2)
    print("KERNEL_OK")
</pallas_src>

<mosaic_0001>
module attributes {stable_mosaic.version = 11 : i64} {
  func.func @_self_attention_kernel(%arg0: i32, %arg1: i32, %arg2: memref<1x33x128xf32, #tpu.memory_space<vmem>>, %arg3: memref<64x33xbf16, #tpu.memory_space<vmem>>, %arg4: memref<1x128xf32, #tpu.memory_space<vmem>>, %arg5: memref<1x1xf32, #tpu.memory_space<smem>>, %arg6: memref<1x32x128xf32, #tpu.memory_space<vmem>>, %arg7: memref<1x128x128xbf16, #tpu.memory_space<vmem>>, %arg8: memref<64x128xbf16, #tpu.memory_space<vmem>>) attributes {dimension_semantics = [#tpu.dimension_semantics<parallel>, #tpu.dimension_semantics<arbitrary>], iteration_bounds = array<i64: 2, 1>, scalar_prefetch = 0 : i64, scratch_operands = 1 : i64, tpu.core_type = #tpu.core_type<tc>, window_params = [{transform_indices = @transform_0, window_bounds = array<i64: 1, 33, 128>}, {pipeline_mode = #tpu.pipeline_mode<synchronous>, transform_indices = @transform_1, window_bounds = array<i64: 64, 33>}, {pipeline_mode = #tpu.pipeline_mode<synchronous>, transform_indices = @transform_2, window_bounds = array<i64: 1, 128>}, {transform_indices = @transform_3, window_bounds = array<i64: 1, 1>}, {transform_indices = @transform_4, window_bounds = array<i64: 1, 32, 128>}, {transform_indices = @transform_5, window_bounds = array<i64: 1, 128, 128>}]} {
    %c0_i32 = arith.constant 0 : i32
    %0 = arith.cmpi eq, %arg1, %c0_i32 : i32
    %1 = arith.extui %0 : i1 to i32
    %c0_i32_0 = arith.constant 0 : i32
    %2 = arith.cmpi ne, %1, %c0_i32_0 : i32
    scf.if %2 {
      %c0_18 = arith.constant 0 : index
      %c0_19 = arith.constant 0 : index
      %c0_20 = arith.constant 0 : index
      %39 = vector.load %arg2[%c0_18, %c0_19, %c0_20] : memref<1x33x128xf32, #tpu.memory_space<vmem>>, vector<1x33x128xf32>
      %40 = vector.shape_cast %39 : vector<1x33x128xf32> to vector<33x128xf32>
      %41 = arith.truncf %40 : vector<33x128xf32> to vector<33x128xbf16>
      %c0_21 = arith.constant 0 : index
      %c0_22 = arith.constant 0 : index
      %42 = vector.load %arg3[%c0_21, %c0_22] : memref<64x33xbf16, #tpu.memory_space<vmem>>, vector<64x33xbf16>
      %cst_23 = arith.constant dense<0.000000e+00> : vector<64x128xf32>
      %43 = tpu.matmul %42, %41, %cst_23 {dimension_numbers = #tpu.dot_dimension_numbers<[1], [0], [0], [1], [0, 0, 1, 1], [], []>} : vector<64x33xbf16>, vector<33x128xbf16>, vector<64x128xf32> -> vector<64x128xf32>
      %44 = arith.truncf %43 : vector<64x128xf32> to vector<64x128xbf16>
      %c0_24 = arith.constant 0 : index
      %c0_25 = arith.constant 0 : index
      %45 = vector.load %arg8[%c0_24, %c0_25] : memref<64x128xbf16, #tpu.memory_space<vmem>>, vector<64x128xbf16>
      tpu.vector_store %arg8[%c0_24, %c0_25], %44 {strides = array<i32>} : memref<64x128xbf16, #tpu.memory_space<vmem>>, vector<64x128xbf16>,
    } else {
    }
    %c128_i32 = arith.constant 128 : i32
    %3 = arith.muli %arg1, %c128_i32 : i32
    %4 = tpu.assume_multiple %3, 128 : i32
    %c0 = arith.constant 0 : index
    %5 = arith.index_cast %4 : i32 to index
    %6 = vector.load %arg8[%c0, %5] : memref<64x128xbf16, #tpu.memory_space<vmem>>, vector<16x128xbf16>
    %c16 = arith.constant 16 : index
    %c0_1 = arith.constant 0 : index
    %7 = vector.load %arg8[%c16, %c0_1] : memref<64x128xbf16, #tpu.memory_space<vmem>>, vector<16x128xbf16>
    %c32 = arith.constant 32 : index
    %c0_2 = arith.constant 0 : index
    %8 = vector.load %arg8[%c32, %c0_2] : memref<64x128xbf16, #tpu.memory_space<vmem>>, vector<32x128xbf16>
    %cst = arith.constant dense<0.000000e+00> : vector<128x128xf32>
    %9 = tpu.matmul %6, %7, %cst {dimension_numbers = #tpu.dot_dimension_numbers<[0], [0], [1], [1], [0, 1, 1, 1], [], []>} : vector<16x128xbf16>, vector<16x128xbf16>, vector<128x128xf32> -> vector<128x128xf32>
    %c0_3 = arith.constant 0 : index
    %c0_4 = arith.constant 0 : index
    %10 = vector.load %arg4[%c0_3, %c0_4] : memref<1x128xf32, #tpu.memory_space<vmem>>, vector<1x128xf32>
    %11 = vector.broadcast %10 : vector<1x128xf32> to vector<128x128xf32>
    %12 = arith.addf %9, %11 : vector<128x128xf32>
    %cst_5 = arith.constant dense<0xFF800000> : vector<128xf32>
    %13 = vector.multi_reduction <maximumf>, %12, %cst_5 [1] : vector<128x128xf32> to vector<128xf32>
    %14 = vector.shape_cast %13 : vector<128xf32> to vector<128x1xf32>
    %15 = vector.broadcast %14 : vector<128x1xf32> to vector<128x128xf32>
    %16 = arith.subf %12, %15 : vector<128x128xf32>
    %17 = math.exp %16 : vector<128x128xf32>
    %cst_6 = arith.constant dense<0.000000e+00> : vector<128xf32>
    %18 = vector.multi_reduction <add>, %17, %cst_6 [1] : vector<128x128xf32> to vector<128xf32>
    %19 = vector.shape_cast %18 : vector<128xf32> to vector<128x1xf32>
    %20 = tpu.reciprocal %19 {approx = true} : vector<128x1xf32> -> vector<128x1xf32>
    %21 = vector.broadcast %20 : vector<128x1xf32> to vector<128x128xf32>
    %22 = arith.mulf %17, %21 : vector<128x128xf32>
    %23 = arith.truncf %22 : vector<128x128xf32> to vector<128x128xbf16>
    %c0_7 = arith.constant 0 : index
    %c0_8 = arith.constant 0 : index
    %c0_9 = arith.constant 0 : index
    %24 = vector.load %arg7[%c0_7, %c0_8, %c0_9] : memref<1x128x128xbf16, #tpu.memory_space<vmem>>, vector<1x128x128xbf16>
    %25 = vector.shape_cast %24 : vector<1x128x128xbf16> to vector<128x128xbf16>
    %26 = vector.shape_cast %23 : vector<128x128xbf16> to vector<1x128x128xbf16>
    tpu.vector_store %arg7[%c0_7, %c0_8, %c0_9], %26 {strides = array<i32>} : memref<1x128x128xbf16, #tpu.memory_space<vmem>>, vector<1x128x128xbf16>,
    %cst_10 = arith.constant dense<0.000000e+00> : vector<128x32xf32>
    %27 = tpu.matmul %23, %8, %cst_10 {dimension_numbers = #tpu.dot_dimension_numbers<[1], [1], [0], [0], [0, 0, 1, 0], [], []>} : vector<128x128xbf16>, vector<32x128xbf16>, vector<128x32xf32> -> vector<128x32xf32>
    %c0_11 = arith.constant 0 : index
    %c0_12 = arith.constant 0 : index
    %28 = memref.load %arg5[%c0_11, %c0_12] : memref<1x1xf32, #tpu.memory_space<smem>>
    %c0_13 = arith.constant 0 : index
    %c0_14 = arith.constant 0 : index
    %29 = arith.index_cast %4 : i32 to index
    %30 = vector.load %arg2[%c0_13, %c0_14, %29] : memref<1x33x128xf32, #tpu.memory_space<vmem>>, vector<1x32x128xf32>
    %31 = vector.shape_cast %30 : vector<1x32x128xf32> to vector<32x128xf32>
    %32 = tpu.transpose %27, [1, 0] : vector<128x32xf32> -> vector<32x128xf32>
    %33 = vector.broadcast %28 : f32 to vector<32x128xf32>
    %34 = arith.mulf %33, %32 : vector<32x128xf32>
    %35 = arith.addf %34, %31 : vector<32x128xf32>
    %c0_15 = arith.constant 0 : index
    %c0_16 = arith.constant 0 : index
    %c0_17 = arith.constant 0 : index
    %36 = vector.load %arg6[%c0_15, %c0_16, %c0_17] : memref<1x32x128xf32, #tpu.memory_space<vmem>>, vector<1x32x128xf32>
    %37 = vector.shape_cast %36 : vector<1x32x128xf32> to vector<32x128xf32>
    %38 = vector.shape_cast %35 : vector<32x128xf32> to vector<1x32x128xf32>
    tpu.vector_store %arg6[%c0_15, %c0_16, %c0_17], %38 {strides = array<i32>} : memref<1x32x128xf32, #tpu.memory_space<vmem>>, vector<1x32x128xf32>,
    return
  }
  func.func @transform_0(%arg0: i32, %arg1: i32) -> (i32, i32, i32) {
    %c0_i32 = arith.constant 0 : i32
    %c0_i32_0 = arith.constant 0 : i32
    %c0_i32_1 = arith.constant 0 : i32
    return %arg0, %c0_i32, %c0_i32_0 : i32, i32, i32
  }
  func.func @transform_1(%arg0: i32, %arg1: i32) -> (i32, i32) {
    %c0_i32 = arith.constant 0 : i32
    %c0_i32_0 = arith.constant 0 : i32
    %c0_i32_1 = arith.constant 0 : i32
    return %c0_i32, %c0_i32_0 : i32, i32
  }
  func.func @transform_2(%arg0: i32, %arg1: i32) -> (i32, i32) {
    %c0_i32 = arith.constant 0 : i32
    %c0_i32_0 = arith.constant 0 : i32
    %c0_i32_1 = arith.constant 0 : i32
    return %c0_i32, %c0_i32_0 : i32, i32
  }
  func.func @transform_3(%arg0: i32, %arg1: i32) -> (i32, i32) {
    %c0_i32 = arith.constant 0 : i32
    %c0_i32_0 = arith.constant 0 : i32
    %c0_i32_1 = arith.constant 0 : i32
    return %c0_i32, %c0_i32_0 : i32, i32
  }
  func.func @transform_4(%arg0: i32, %arg1: i32) -> (i32, i32, i32) {
    %c0_i32 = arith.constant 0 : i32
    %c0_i32_0 = arith.constant 0 : i32
    return %arg0, %c0_i32, %arg1 : i32, i32, i32
  }
  func.func @transform_5(%arg0: i32, %arg1: i32) -> (i32, i32, i32) {
    %c0_i32 = arith.constant 0 : i32
    %c0_i32_0 = arith.constant 0 : i32
    return %arg0, %arg1, %c0_i32 : i32, i32, i32
  }
}

</mosaic_0001>

<bundles_post_ra>
// kernel: tpu_custom_call.1
= control target key start
LH: loop header
LB: loop body
LE: loop exit
PB: predicated region body
PF: predicated region fallthrough
CT: control target
= control target key end

     0   :  { %s1967_s0 = inlined_call_operand.vmem [shape: f32[2,33,128], index: 0, kind: input, shape index: {}]   ;;  %s1968_s1 = inlined_call_operand.vmem [shape: bf16[64,33], index: 1, kind: input, shape index: {}]   ;;  %s1969_s2 = inlined_call_operand.vmem [shape: f32[1,128], index: 2, kind: input, shape index: {}]   ;;  %s1970_s3 = inlined_call_operand.<no memory space> [shape: f32[1,1], index: 3, kind: input, shape index: {}]   ;;  %s1971_s4 = inlined_call_operand.hbm [shape: f32[2,32,128], index: 4, kind: output, shape index: {0}]   ;;  %s1972_s5 = inlined_call_operand.hbm [shape: bf16[2,128,128], index: 5, kind: output, shape index: {1}]  }
   0x1   :  { %11 = sst [smem:[#allocation3]] %s1970_s3 }
   0x2   :  { %12 = vsyncpa [#allocation5], 0 }
   0x3   :  { %14 = vsyncpa [#allocation5 + $0x1], 0 }
   0x4   :  { %15 = vsyncpa [#allocation7], 0 }
   0x5   :  { %17 = vsyncpa [#allocation7 + $0x1], 0  ;;  %s1644_s20 = smov 0   ;;  %s1646_s21 = smov 0  }
   0x6   :  { %s1648_s22 = smov 0   ;;  %s1650_s23 = smov 0  }
   0x7   :  { %s1652_s24 = smov 0   ;;  %s1654_s25 = smov 0  }
   0x8 LB: > { %s1119_s3 = sadd.s32 4294967295, %s1602_s25   ;;  %s1120_s26 = sadd.s32 4294967294, %s1602_s25   ;;  %s1602_s25 = sphi %s1654_s25, %s23_s25   ;;  %s1598_s24 = sphi %s1652_s24, %s1979_s24   ;;  %s1594_s23 = sphi %s1650_s23, %s1978_s23   ;;  %s1590_s22 = sphi %s1648_s22, %s1977_s22   ;;  %s1586_s21 = sphi %s1646_s21, %s1976_s21   ;;  %s1582_s20 = sphi %s1644_s20, %s1975_s20  }
   0x9   : > { %s35_s27 = sadd.s32 1, %s1598_s24  ;;  %s133_s28 = sadd.s32 1, %s1590_s22 }
   0xa   : > { %p37_p0 = scmp.ge.s32.totalorder %s35_s27, 2  ;;  %p143_p1 = scmp.ne.s32.totalorder %s1590_s22, %s1586_s21 }
   0xb   : > { %p144_p2 = scmp.eq.s32.totalorder %s1119_s3, 1  ;;  %p149_p3 = scmp.ne.s32.totalorder %s1586_s21, %s1582_s20 }
   0xc   : > { %s1981_s27 = smov (%p37_p0, %s35_s27), 0  ;;  %p150_p5 = scmp.eq.s32.totalorder %s1120_s26, 1 }
   0xd   : > { %p1684_p4 = por %p144_p2, %p143_p1  ;;  %s128_s30 = ssub.s32 %s1598_s24, %s1981_s27 }
   0xe   : > { %p1123_p6 = scmp.ge.s32.totalorder %s1602_s25, 1  ;;  %p131_p7 = scmp.eq.s32.totalorder %s128_s30, 0 }
   0xf   : > { %p1691_p8 = por %p150_p5, %p149_p3  ;;  %p213_p9 = scmp.lt.s32.totalorder %s1602_s25, 3 }
  0x10   : > { %s1697_s7 = scalar_select %p131_p7, %s1590_s22, %s133_s28  }
  0x11   : > { %p214_p10 = pnand %p1123_p6, %p213_p9 }
  0x12   : > { %p246_p11 = scmp.lt.s32.totalorder (!%p214_p10), %s1594_s23, 1  ;;  %s1848_s30 = sand.u32 (!%p214_p10), 1, %s1586_s21  }
  0x13   : > { %217 = sbr.rel (%p214_p10) target bundleno = 1238 (0x4d6), region = 36  ;;  %s1125_s8 = sshll.u32 (!%p214_p10), %s1848_s30, 6 }
  0x14   : > { %s1853_s9 = scalar_lea.vmem (!%p214_p10), [#allocation6], %s1125_s8  ;;  %s977_s15 = scalar_lea.sflag (!%p214_p10), [#allocation7], %s1848_s30 }
  0x15   : > { %s1605_s17 = smov (!%p214_p10), [#allocation6]  }
  0x16   : > { %s1500_s18 = sshll.u32 (!%p214_p10), %s1605_s17, 4  ;;  %s1501_s18 = int_to_ptr.vmem [resolvable:$false] %s1500_s18 }
  0x17   : > { %s1502_s19 = scalar_lea.vmem (!%p214_p10), %s1501_s18, 2048 }
  0x18   : > { %v1424_v0 = vld [vmem:[%s1968_s1] sm:$0xff]   ;;  %vm293_vm0 = vcmask 269312   ;;  %s247_s10 = scalar_select %p246_p11, %s1594_s23, 1  ;;  %vm306_vm1 = vcmask 1040384   ;;  %v1604_v2 = vmov 0   ;;  %v1425_v12 = vld [vmem:[%s1968_s1 + $0x8] sm:$0xff]  }
  0x19   : > { %1308 = vmatprep.mubr.msk.bf16.mxu0 %vm293_vm0, %v1424_v0  ;;  %v308_v3 = vsel %vm306_vm1, 65535, %v1604_v2  ;;  %vm465_vm2 = vcmask 130048   ;;  %v1428_v29 = vld [vmem:[%s1968_s1 + $0x10] sm:$0xff]   ;;  %v1429_v30 = vld [vmem:[%s1968_s1 + $0x18] sm:$0xff]   ;;  %v1143_v31 = vld [vmem:[%s1969_s2] ss:$0 sm:$0xff] }
  0x1a   : > { %s1358_s11 = smul.u32 40, %s247_s10  ;;  %s1205_s10 = sshll.u32 %s1594_s23, 10 }
  0x1b   : > { %s1881_s13 = scalar_lea.hbm %s1972_s5, %s1205_s10 }
  0x1c   : > { %s250_s14 = scalar_lea.vmem %s1967_s0, %s1358_s11 }
  0x1d   : > { %v261_v1 = vld [vmem:[%s250_s14 + $0x20] sm:$0x1]  ;;  %v1708_v4 = vld [vmem:[%s250_s14 + $0x10] sm:$0xff]  ;;  %v1710_v5 = vld [vmem:[%s250_s14 + $0x18] sm:$0xff] }
  0x1e   : > { %v264_v6 = vpack.c.bf16 %v261_v1, %v261_v1  ;;  %v263_v8 = vpack.c.bf16 %v1710_v5, %v1708_v4  ;;  %v1714_v9 = vld [vmem:[%s250_s14] sm:$0xff]  ;;  %v1716_v10 = vld [vmem:[%s250_s14 + $0x8] sm:$0xff]  ;;  %s1009_s14 = sshll.u32 %s1853_s9, 4  ;;  %s1884_s14 = int_to_ptr.vmem [resolvable:$true] %s1009_s14 }
  0x1f   : > { %v262_v11 = vpack.c.bf16 %v1716_v10, %v1714_v9  ;;  %s1496_s16 = scalar_lea.vmem %s1884_s14, 1024  ;;  %p1503_p1 = scmp.lt.s32.totalorder %s1884_s14, %s1501_s18 }
  0x20   : > { %v310_v7 = vand.u32 %v308_v3, %v264_v6  ;;  %p1497_p12 = scmp.ne.s32.totalorder %s1884_s14, %s1496_s16  ;;  %p1504_p2 = scmp.lt.s32.totalorder %s1502_s19, %s1496_s16 }
  0x22   : > { %1302 = vmatprep.subr.bf16.mxu0 %v310_v7  ;;  %p1498_p13 = pnand %p1497_p12, %p1684_p4  ;;  %p1505_p3 = por %p1504_p2, %p1503_p1 }
  0x23   : > { %1303 = vmatpush3.bf16.msra.mxu0 %v310_v7 }
  0x24   : > { %1304 = vmatprep.subr.bf16.mxu0 %v263_v8  ;;  %p1499_p0 = pneg %p1498_p13 }
  0x26   : > { %p1506_p5 = pnand %p1505_p3, %p1499_p0 }
  0x27   : > { %1305 = vmatpush3.bf16.msra.mxu0 %v263_v8 }
  0x28   : > { %1306 = vmatprep.subr.bf16.mxu0 %v262_v11 }
  0x2b   : > { %1307 = vmatpush3.bf16.msra.mxu0 %v262_v11 }
  0x2e   : > { %1309 = vmatmul.mubr.msk.bf16.vlgmr.msra.gmra.mxu0 %vm293_vm0, %v1425_v12 }
  0x2f   : > { %1312 = vmatprep.mubr.msk.bf16.mxu0 %vm293_vm0, %v1428_v29 }
  0x36   : > { %1313 = vmatmul.mubr.msk.bf16.gmra.mxu0 %vm293_vm0, %v1429_v30 }
  0xee   : > { %v1310_v13 = vpop.f32.mrf.mxu0 }
  0xf0   : > { %v346_v14 = vpop.f32.mrf.mxu0 }
  0xf2   : > { %v1311_v15 = vpop.f32.mrf.mxu0 }
  0xf3   : > { %v1214_v16 = vpack.c.bf16 %v1311_v15, %v1310_v13 }
  0xf4   : > { %v349_v17 = vpop.f32.mrf.mxu0 }
  0xf5   : > { %1266 = vst [vmem:[#allocation2 + $0x8] sm:$0xff] %v1214_v16   ;;  %v1209_v18 = vpack.c.bf16 %v349_v17, %v346_v14 }
  0xf6   : > { %v1314_v0 = vpop.f32.mrf.mxu0 }
  0xf7   : > { %1210 = vst [vmem:[#allocation2] sm:$0xff] %v1209_v18  }
  0xf8   : > { %v362_v1 = vpop.f32.mrf.mxu0 }
  0xfa   : > { %v1315_v2 = vpop.f32.mrf.mxu0 }
  0xfb   : > { %v1224_v3 = vpack.c.bf16 %v1315_v2, %v1314_v0 }
  0xfc   : > { %v1426_v19 = vld [vmem:[#allocation2 + $0x8] sm:$0xff]   ;;  %v365_v6 = vpop.f32.mrf.mxu0 }
  0xfd   : > { %1316 = vmatprep.subr.bf16.mxu1 %v1426_v19  ;;  %1268 = vst [vmem:[#allocation2 + $0x18] sm:$0xff] %v1224_v3   ;;  %v1219_v7 = vpack.c.bf16 %v365_v6, %v362_v1 }
  0xfe   : > { %v1427_v20 = vld [vmem:[#allocation2] sm:$0xff]   ;;  %1317 = vmatpush3.bf16.msra.mxu1 %v1426_v19 }
  0xff   : > { %443 = vxpose.xlu0.c.b16.start.end [1/1] (short) %v1427_v20, 128  ;;  %1267 = vst [vmem:[#allocation2 + $0x10] sm:$0xff] %v1219_v7  }
 0x104   : > { %v1430_v8 = vld [vmem:[#allocation2 + $0x18] sm:$0xff]  }
 0x105   : > { %1334 = vmatprep.subr.bf16.mxu0 %v1430_v8  ;;  %1354 = vmatprep.subr.bf16.mxu1 %v1430_v8 }
 0x106   : > { %1335 = vmatpush3.bf16.xpose.msra.mxu0 %v1430_v8 }
 0x161   : > { %v451_v21 = vpop.trf.xlu0 }
 0x162   : > { %1318 = vmatprep.mubr.msk.bf16.mxu1 %vm465_vm2, %v451_v21 }
 0x165   : > { %v452_v22 = vpop.trf.xlu0 }
 0x166   : > { %1319 = vmatmul.mubr.msk.bf16.vlgmr.msra.gmra.mxu1 %vm465_vm2, %v452_v22 }
 0x167   : > { %1356 = vmatpush3.bf16.xpose.msra.mxu1 %v1430_v8 }
 0x169   : > { %v453_v23 = vpop.trf.xlu0 }
 0x16a   : > { %1322 = vmatprep.mubr.msk.bf16.mxu1 %vm465_vm2, %v453_v23 }
 0x16d   : > { %v454_v24 = vpop.trf.xlu0 }
 0x16e   : > { %1323 = vmatmul.mubr.msk.bf16.gmra.mxu1 %vm465_vm2, %v454_v24 }
 0x171   : > { %v455_v25 = vpop.trf.xlu0 }
 0x172   : > { %1326 = vmatprep.mubr.msk.bf16.mxu1 %vm465_vm2, %v455_v25 }
 0x175   : > { %v456_v26 = vpop.trf.xlu0 }
 0x176   : > { %1327 = vmatmul.mubr.msk.bf16.gmra.mxu1 %vm465_vm2, %v456_v26 }
 0x179   : > { %v457_v27 = vpop.trf.xlu0 }
 0x17a   : > { %1330 = vmatprep.mubr.msk.bf16.mxu1 %vm465_vm2, %v457_v27 }
 0x17d   : > { %v458_v28 = vpop.trf.xlu0 }
 0x17e   : > { %1331 = vmatmul.mubr.msk.bf16.gmra.mxu1 %vm465_vm2, %v458_v28 }
 0x226   : > { %v1320_v32 = vpop.f32.mrf.mxu1 }
 0x227   : > { %v1743_v33 = vadd.f32 %v1320_v32, %v1143_v31 }
 0x228   : > { %v524_v34 = vpop.f32.mrf.mxu1 }
 0x229   : > { %v1745_v35 = vadd.f32 %v1143_v31, %v524_v34  ;;  %591 = vmax.xlane.f32.xlu1 %v1743_v33 }
 0x22a   : > { %v1321_v36 = vpop.f32.mrf.mxu1 }
 0x22b   : > { %v1748_v37 = vadd.f32 %v1321_v36, %v1143_v31  ;;  %587 = vmax.xlane.f32.xlu0 %v1745_v35 }
 0x22c   : > { %v527_v38 = vpop.f32.mrf.mxu1 }
 0x22d   : > { %593 = vmax.xlane.f32.xlu1 %v1748_v37  ;;  %v528_v40 = vadd.f32 %v1143_v31, %v527_v38 }
 0x22e   : > { %v1324_v39 = vpop.f32.mrf.mxu1 }
 0x22f   : > { %v1752_v42 = vadd.f32 %v1324_v39, %v1143_v31 }
 0x230   : > { %v540_v41 = vpop.f32.mrf.mxu1 }
 0x231   : > { %589 = vmax.xlane.f32.xlu1 %v528_v40  ;;  %v541_v46 = vadd.f32 %v1143_v31, %v540_v41 }
 0x232   : > { %v1325_v43 = vpop.f32.mrf.mxu1 }
 0x233   : > { %v1755_v49 = vadd.f32 %v1325_v43, %v1143_v31 }
 0x234   : > { %v543_v44 = vpop.f32.mrf.mxu1 }
 0x235   : > { %599 = vmax.xlane.f32.xlu1 %v1752_v42  ;;  %v1758_v52 = vadd.f32 %v1143_v31, %v543_v44 }
 0x236   : > { %v1328_v45 = vpop.f32.mrf.mxu1 }
 0x237   : > { %v1760_v54 = vadd.f32 %v1328_v45, %v1143_v31 }
 0x238   : > { %v556_v47 = vpop.f32.mrf.mxu1 }
 0x239   : > { %595 = vmax.xlane.f32.xlu1 %v541_v46  ;;  %v1763_v57 = vadd.f32 %v1143_v31, %v556_v47 }
 0x23a   : > { %v1329_v48 = vpop.f32.mrf.mxu1 }
 0x23b   : > { %v1776_v61 = vadd.f32 %v1329_v48, %v1143_v31  ;;  %v1431_v48 = vld [vmem:[#allocation2 + $0x10] sm:$0xff]  }
 0x23c   : > { %v559_v50 = vpop.f32.mrf.mxu1  ;;  %1336 = vmatprep.subr.bf16.mxu0 %v1431_v48  ;;  %1355 = vmatprep.subr.bf16.mxu1 %v1431_v48 }
 0x23d   : > { %601 = vmax.xlane.f32.xlu1 %v1755_v49  ;;  %v1772_v60 = vadd.f32 %v1143_v31, %v559_v50  ;;  %1337 = vmatpush3.bf16.xpose.msra.mxu0 %v1431_v48 }
 0x23e   : > { %v1332_v51 = vpop.f32.mrf.mxu1  ;;  %1357 = vmatpush3.bf16.xpose.msra.mxu1 %v1431_v48 }
 0x23f   : > { %v1781_v63 = vadd.f32 %v1332_v51, %v1143_v31 }
 0x240   : > { %v572_v53 = vpop.f32.mrf.mxu1 }
 0x241   : > { %597 = vmax.xlane.f32.xlu1 %v1758_v52  ;;  %v1778_v62 = vadd.f32 %v1143_v31, %v572_v53 }
 0x242   : > { %v1333_v55 = vpop.f32.mrf.mxu1 }
 0x243   : > { %v1768_v59 = vadd.f32 %v1333_v55, %v1143_v31 }
 0x244   : > { %v575_v56 = vpop.f32.mrf.mxu1 }
 0x245   : > { %v1765_v58 = vadd.f32 %v1143_v31, %v575_v56  ;;  %607 = vmax.xlane.f32.xlu1 %v1760_v54 }
 0x247   : > { %613 = vmax.xlane.f32.xlu0 %v1765_v58 }
 0x249   : > { %603 = vmax.xlane.f32.xlu1 %v1763_v57 }
 0x24b   : > { %617 = vmax.xlane.f32.xlu0 %v1768_v59 }
 0x24d   : > { %605 = vmax.xlane.f32.xlu1 %v1772_v60 }
 0x251   : > { %609 = vmax.xlane.f32.xlu1 %v1776_v61 }
 0x255   : > { %611 = vmax.xlane.f32.xlu1 %v1778_v62 }
 0x259   : > { %615 = vmax.xlane.f32.xlu1 %v1781_v63 }
 0x2b2   : > { %v592_v11 = vpop.xlane.xlu1 %591 }
 0x2b3   : > { %v621_v13 = vsub.f32 %v1743_v33, %v592_v11 }
 0x2b4   : > { %v588_v12 = vpop.xlane.xlu0 %587 }
 0x2b5   : > { %v619_v14 = vsub.f32 %v1745_v35, %v588_v12  ;;  %v639_v17 = vmul.f32 1.442695, %v621_v13 }
 0x2b6   : > { %v594_v15 = vpop.xlane.xlu1 %593 }
 0x2b7   : > { %v635_v16 = vmul.f32 1.442695, %v619_v14  ;;  %v622_v19 = vsub.f32 %v1748_v37, %v594_v15 }
 0x2b9   : > { %1432 = vpow2.f32 %v635_v16  ;;  %v641_v23 = vmul.f32 1.442695, %v622_v19 }
 0x2ba   : > { %v590_v18 = vpop.xlane.xlu1 %589  ;;  %1434 = vpow2.f32 %v639_v17 }
 0x2bb   : > { %v620_v20 = vsub.f32 %v528_v40, %v590_v18 }
 0x2bd   : > { %v637_v21 = vmul.f32 1.442695, %v620_v20 }
 0x2be   : > { %v600_v22 = vpop.xlane.xlu1 %599 }
 0x2bf   : > { %1436 = vpow2.f32 %v637_v21  ;;  %v625_v25 = vsub.f32 %v1752_v42, %v600_v22 }
 0x2c0   : > { %1438 = vpow2.f32 %v641_v23 }
 0x2c1   : > { %v647_v30 = vmul.f32 1.442695, %v625_v25 }
 0x2c2   : > { %v596_v24 = vpop.xlane.xlu1 %595 }
 0x2c3   : > { %v623_v26 = vsub.f32 %v541_v46, %v596_v24 }
 0x2c5   : > { %v643_v27 = vmul.f32 1.442695, %v623_v26 }
 0x2c6   : > { %v1789_v28 = vpop.eup %1432  ;;  %v602_v29 = vpop.xlane.xlu1 %601 }
 0x2c7   : > { %1440 = vpow2.f32 %v643_v27  ;;  %667 = vadd.xlane.f32.xlu1 %v1789_v28  ;;  %v1792_v31 = vpop.eup %1434  ;;  %v626_v33 = vsub.f32 %v1755_v49, %v602_v29 }
 0x2c8   : > { %1442 = vpow2.f32 %v647_v30 }
 0x2c9   : > { %v649_v38 = vmul.f32 1.442695, %v626_v33 }
 0x2ca   : > { %v598_v32 = vpop.xlane.xlu1 %597 }
 0x2cb   : > { %v624_v34 = vsub.f32 %v1758_v52, %v598_v32  ;;  %671 = vadd.xlane.f32.xlu1 %v1792_v31 }
 0x2cc   : > { %v1797_v35 = vpop.eup %1436 }
 0x2cd   : > { %v645_v36 = vmul.f32 1.442695, %v624_v34  ;;  %669 = vadd.xlane.f32.xlu0 %v1797_v35  ;;  %v1800_v39 = vpop.eup %1438 }
 0x2ce   : > { %v608_v37 = vpop.xlane.xlu1 %607 }
 0x2cf   : > { %1444 = vpow2.f32 %v645_v36  ;;  %v629_v40 = vsub.f32 %v1760_v54, %v608_v37 }
 0x2d0   : > { %1446 = vpow2.f32 %v649_v38  ;;  %v614_v44 = vpop.xlane.xlu0 %613 }
 0x2d1   : > { %673 = vadd.xlane.f32.xlu0 %v1800_v39  ;;  %v655_v46 = vmul.f32 1.442695, %v629_v40  ;;  %v632_v52 = vsub.f32 %v1765_v58, %v614_v44 }
 0x2d2   : > { %v604_v41 = vpop.xlane.xlu1 %603 }
 0x2d3   : > { %v627_v42 = vsub.f32 %v1763_v57, %v604_v41 }
 0x2d4   : > { %v1805_v43 = vpop.eup %1440  ;;  %v618_v54 = vpop.xlane.xlu0 %617 }
 0x2d5   : > { %v651_v45 = vmul.f32 1.442695, %v627_v42  ;;  %675 = vadd.xlane.f32.xlu1 %v1805_v43  ;;  %v1809_v50 = vpop.eup %1442  ;;  %v634_v0 = vsub.f32 %v1768_v59, %v618_v54 }
 0x2d6   : > { %v606_v47 = vpop.xlane.xlu1 %605 }
 0x2d7   : > { %1448 = vpow2.f32 %v651_v45  ;;  %v628_v49 = vsub.f32 %v1772_v60, %v606_v47  ;;  %v661_v60 = vmul.f32 1.442695, %v632_v52  ;;  %v665_v6 = vmul.f32 1.442695, %v634_v0 }
 0x2d8   : > { %1450 = vpow2.f32 %v655_v46 }
 0x2d9   : > { %v653_v51 = vmul.f32 1.442695, %v628_v49  ;;  %679 = vadd.xlane.f32.xlu1 %v1809_v50 }
 0x2da   : > { %v610_v53 = vpop.xlane.xlu1 %609 }
 0x2db   : > { %1452 = vpow2.f32 %v653_v51  ;;  %v630_v55 = vsub.f32 %v1776_v61, %v610_v53 }
 0x2dc   : > { %v1814_v56 = vpop.eup %1444 }
 0x2dd   : > { %v657_v57 = vmul.f32 1.442695, %v630_v55  ;;  %677 = vadd.xlane.f32.xlu0 %v1814_v56  ;;  %v1819_v3 = vpop.eup %1446 }
 0x2de   : > { %v612_v1 = vpop.xlane.xlu1 %611 }
 0x2df   : > { %1454 = vpow2.f32 %v657_v57  ;;  %v631_v2 = vsub.f32 %v1778_v62, %v612_v1 }
 0x2e0   : > { %1456 = vpow2.f32 %v661_v60 }
 0x2e1   : > { %v659_v58 = vmul.f32 1.442695, %v631_v2  ;;  %681 = vadd.xlane.f32.xlu0 %v1819_v3 }
 0x2e2   : > { %v616_v61 = vpop.xlane.xlu1 %615 }
 0x2e3   : > { %1458 = vpow2.f32 %v659_v58  ;;  %v633_v7 = vsub.f32 %v1781_v63, %v616_v61 }
 0x2e4   : > { %v1823_v8 = vpop.eup %1448  ;;  %1460 = vpow2.f32 %v665_v6 }
 0x2e5   : > { %v663_v11 = vmul.f32 1.442695, %v633_v7  ;;  %683 = vadd.xlane.f32.xlu1 %v1823_v8  ;;  %v1826_v59 = vpop.eup %1450 }
 0x2e7   : > { %1462 = vpow2.f32 %v663_v11 }
 0x2e8   : > { %v1828_v62 = vpop.eup %1452 }
 0x2e9   : > { %685 = vadd.xlane.f32.xlu0 %v1828_v62  ;;  %687 = vadd.xlane.f32.xlu1 %v1826_v59 }
 0x2ec   : > { %v1832_v12 = vpop.eup %1454 }
 0x2ed   : > { %689 = vadd.xlane.f32.xlu0 %v1832_v12  ;;  %v1835_v63 = vpop.eup %1456 }
 0x2f0   : > { %v1837_v13 = vpop.eup %1458 }
 0x2f1   : > { %691 = vadd.xlane.f32.xlu1 %v1837_v13  ;;  %693 = vadd.xlane.f32.xlu0 %v1835_v63  ;;  %v1841_v14 = vpop.eup %1460 }
 0x2f4   : > { %v1843_v15 = vpop.eup %1462 }
 0x2f5   : > { %695 = vadd.xlane.f32.xlu1 %v1843_v15  ;;  %697 = vadd.xlane.f32.xlu0 %v1841_v14 }
 0x350   : > { %v668_v16 = vpop.xlane.xlu1 %667 }
 0x351   : > { %1464 = vrcp.f32 %v668_v16 }
 0x354   : > { %v672_v17 = vpop.xlane.xlu1 %671 }
 0x356   : > { %v670_v18 = vpop.xlane.xlu0 %669 }
 0x357   : > { %1466 = vrcp.f32 %v670_v18 }
 0x358   : > { %1468 = vrcp.f32 %v672_v17 }
 0x35a   : > { %v674_v19 = vpop.xlane.xlu0 %673 }
 0x35b   : > { %1470 = vrcp.f32 %v674_v19 }
 0x35e   : > { %v676_v20 = vpop.xlane.xlu1 %675  ;;  %v1465_v21 = vpop.eup %1464 }
 0x35f   : > { %1472 = vrcp.f32 %v676_v20  ;;  %v715_v23 = vmul.f32 %v1465_v21, %v1789_v28 }
 0x362   : > { %v680_v26 = vpop.xlane.xlu1 %679 }
 0x364   : > { %v1467_v22 = vpop.eup %1466 }
 0x365   : > { %v716_v24 = vmul.f32 %v1467_v22, %v1797_v35  ;;  %v1469_v25 = vpop.eup %1468 }
 0x366   : > { %v678_v27 = vpop.xlane.xlu0 %677  ;;  %v717_v32 = vmul.f32 %v1469_v25, %v1792_v31 }
 0x367   : > { %1474 = vrcp.f32 %v678_v27  ;;  %v731_v29 = vpack.c.bf16 %v716_v24, %v715_v23 }
 0x368   : > { %v1471_v30 = vpop.eup %1470  ;;  %1476 = vrcp.f32 %v680_v26 }
 0x369   : > { %1230 = vst [vmem:[%s1853_s9] sm:$0xff] %v731_v29   ;;  %1338 = vmatprep.mubr.bf16.mxu0 %v731_v29  ;;  %v718_v33 = vmul.f32 %v1471_v30, %v1800_v39 }
 0x36a   : > { %v682_v28 = vpop.xlane.xlu0 %681 }
 0x36b   : > { %1478 = vrcp.f32 %v682_v28  ;;  %v732_v34 = vpack.c.bf16 %v718_v33, %v717_v32 }
 0x36c   : > { %v1473_v36 = vpop.eup %1472 }
 0x36d   : > { %1269 = vst [vmem:[%s1853_s9 + $0x8] sm:$0xff] %v732_v34   ;;  %1339 = vmatmul.mubr.bf16.vlgmr.msra.gmra.mxu0 %v732_v34  ;;  %v719_v41 = vmul.f32 %v1473_v36, %v1805_v43 }
 0x36e   : > { %v684_v35 = vpop.xlane.xlu1 %683 }
 0x36f   : > { %1480 = vrcp.f32 %v684_v35 }
 0x372   : > { %v688_v37 = vpop.xlane.xlu1 %687  ;;  %v686_v38 = vpop.xlane.xlu0 %685 }
 0x373   : > { %1482 = vrcp.f32 %v686_v38 }
 0x374   : > { %v1475_v40 = vpop.eup %1474  ;;  %1484 = vrcp.f32 %v688_v37 }
 0x375   : > { %v720_v31 = vmul.f32 %v1475_v40, %v1814_v56  ;;  %v1477_v39 = vpop.eup %1476 }
 0x376   : > { %v690_v42 = vpop.xlane.xlu0 %689  ;;  %v721_v46 = vmul.f32 %v1477_v39, %v1809_v50 }
 0x377   : > { %1486 = vrcp.f32 %v690_v42  ;;  %v733_v44 = vpack.c.bf16 %v720_v31, %v719_v41 }
 0x378   : > { %v1479_v45 = vpop.eup %1478 }
 0x379   : > { %1270 = vst [vmem:[%s1853_s9 + $0x10] sm:$0xff] %v733_v44   ;;  %1342 = vmatprep.mubr.bf16.mxu0 %v733_v44  ;;  %v722_v47 = vmul.f32 %v1479_v45, %v1819_v3 }
 0x37a   : > { %v692_v48 = vpop.xlane.xlu1 %691  ;;  %v694_v49 = vpop.xlane.xlu0 %693 }
 0x37b   : > { %1488 = vrcp.f32 %v692_v48  ;;  %v734_v51 = vpack.c.bf16 %v722_v47, %v721_v46 }
 0x37c   : > { %1490 = vrcp.f32 %v694_v49  ;;  %v1481_v53 = vpop.eup %1480 }
 0x37d   : > { %1271 = vst [vmem:[%s1853_s9 + $0x18] sm:$0xff] %v734_v51   ;;  %1343 = vmatmul.mubr.bf16.gmra.mxu0 %v734_v51  ;;  %v723_v50 = vmul.f32 %v1481_v53, %v1823_v8 }
 0x37e   : > { %v696_v43 = vpop.xlane.xlu1 %695  ;;  %v698_v52 = vpop.xlane.xlu0 %697 }
 0x37f   : > { %1492 = vrcp.f32 %v696_v43 }
 0x380   : > { %1494 = vrcp.f32 %v698_v52  ;;  %v1483_v54 = vpop.eup %1482 }
 0x381   : > { %v1485_v55 = vpop.eup %1484  ;;  %v724_v56 = vmul.f32 %v1483_v54, %v1828_v62 }
 0x382   : > { %v725_v0 = vmul.f32 %v1485_v55, %v1826_v59 }
 0x383   : > { %v735_v60 = vpack.c.bf16 %v724_v56, %v723_v50 }
 0x384   : > { %v1487_v57 = vpop.eup %1486 }
 0x385   : > { %v726_v1 = vmul.f32 %v1487_v57, %v1832_v12  ;;  %1272 = vst [vmem:[%s1853_s9 + $0x20] sm:$0xff] %v735_v60   ;;  %1346 = vmatprep.mubr.bf16.mxu0 %v735_v60 }
 0x387   : > { %v736_v2 = vpack.c.bf16 %v726_v1, %v725_v0 }
 0x388   : > { %v1489_v3 = vpop.eup %1488 }
 0x389   : > { %v1491_v58 = vpop.eup %1490  ;;  %1273 = vst [vmem:[%s1853_s9 + $0x28] sm:$0xff] %v736_v2   ;;  %1347 = vmatmul.mubr.bf16.gmra.mxu0 %v736_v2  ;;  %v727_v6 = vmul.f32 %v1489_v3, %v1837_v13 }
 0x38a   : > { %v728_v61 = vmul.f32 %v1491_v58, %v1835_v63 }
 0x38c   : > { %v1493_v7 = vpop.eup %1492  ;;  %v737_v8 = vpack.c.bf16 %v728_v61, %v727_v6 }
 0x38d   : > { %v1495_v11 = vpop.eup %1494  ;;  %v729_v59 = vmul.f32 %v1493_v7, %v1843_v15 }
 0x38e   : > { %v730_v62 = vmul.f32 %v1495_v11, %v1841_v14  ;;  %1274 = vst [vmem:[%s1853_s9 + $0x30] sm:$0xff] %v737_v8   ;;  %1350 = vmatprep.mubr.bf16.mxu1 %v737_v8 }
 0x390   : > { %v738_v12 = vpack.c.bf16 %v730_v62, %v729_v59 }
 0x392   : > { %1275 = vst [vmem:[%s1853_s9 + $0x38] sm:$0xff] %v738_v12   ;;  %1351 = vmatmul.mubr.bf16.vlgmr.msra.gmra.mxu1 %v738_v12 }
 0x42d   : > { %v1340_v16 = vpop.f32.mrf.mxu0 }
 0x42f   : > { %v857_v17 = vpop.f32.mrf.mxu0 }
 0x430   : > { %926 = vxpose.xlu1.b32.start [1/16] (narrow) %v857_v17, 32 }
 0x431   : > { %v1341_v13 = vpop.f32.mrf.mxu0 }
 0x433   : > { %v860_v63 = vpop.f32.mrf.mxu0 }
 0x434   : > { %927 = vxpose.xlu1.b32.cont [2/16] (narrow) %v860_v63, 32 }
 0x438   : > { %928 = vxpose.xlu1.b32.cont [3/16] (narrow) %v1340_v16, 32 }
 0x43c   : > { %929 = vxpose.xlu1.b32.cont [4/16] (narrow) %v1341_v13, 32 }
 0x43d   : > { %v1344_v15 = vpop.f32.mrf.mxu0 }
 0x43f   : > { %v873_v18 = vpop.f32.mrf.mxu0 }
 0x440   : > { %930 = vxpose.xlu1.b32.cont [5/16] (narrow) %v873_v18, 32 }
 0x441   : > { %v1345_v14 = vpop.f32.mrf.mxu0 }
 0x443   : > { %v876_v19 = vpop.f32.mrf.mxu0 }
 0x444   : > { %1509 = shalt.err (!%p1506_p5)
}
 0x445   : > { %s1510_s3 = scalar_lea.hbm %s1881_s13, 1024  ;;  %s1514_s8 = scalar_lea.hbm %s1972_s5, 2048 }
 0x446   : > { %p1511_p6 = scmp.ne.s32.totalorder %s1881_s13, %s1510_s3  ;;  %p1515_p10 = scmp.lt.s32.totalorder %s1881_s13, %s1972_s5 }
 0x447   : > { %p1516_p11 = scmp.lt.s32.totalorder %s1514_s8, %s1510_s3 }
 0x448   : > { %p1512_p7 = pnand %p1511_p6, %p1684_p4 }
 0x449   : > { %p1517_p12 = por %p1516_p11, %p1515_p10 }
 0x44a   : > { %p1513_p9 = pneg %p1512_p7 }
 0x44c   : > { %p1518_p13 = pnand %p1517_p12, %p1513_p9 }
 0x44e   : > { %1521 = shalt.err (!%p1518_p13)
}
 0x44f   : > { %s1606_s11 = smov 64   ;;  %s1607_s12 = smov 4   ;;  %931 = vxpose.xlu1.b32.cont [6/16] (narrow) %v876_v19, 32  ;;  %v1348_v20 = vpop.f32.mrf.mxu0 }
 0x450   : > { %1360 = dma.vmem_to_hbm [thread:$0]  (%p1684_p4), %s1884_s14, 1024, %s1881_s13, %s977_s15, %s1606_s11, %s1606_s11, %s1607_s12  }
 0x451   : > { %v889_v21 = vpop.f32.mrf.mxu0  ;;  %s920_s13 = sld [smem:[#allocation3]]  ;;  %s1124_s14 = sshll.u32 %s1848_s30, 5 }
 0x452   : > { %v1352_v24 = vpop.f32.mrf.mxu1  ;;  %s238_s15 = scalar_lea.vmem [#allocation4], %s1124_s14  ;;  %s1204_s17 = sshll.u32 %s1594_s23, 9 }
 0x453   : > { %932 = vxpose.xlu1.b32.cont [7/16] (narrow) %v1344_v15, 32  ;;  %v1349_v22 = vpop.f32.mrf.mxu0  ;;  %s991_s16 = sshll.u32 %s238_s15, 4  ;;  %s1919_s3 = scalar_lea.hbm %s1971_s4, %s1204_s17  ;;  %s1914_s16 = int_to_ptr.vmem [resolvable:$true] %s991_s16 }
 0x454   : > { %v905_v25 = vpop.f32.mrf.mxu1  ;;  %s972_s26 = scalar_lea.sflag [#allocation5], %s1848_s30  ;;  %s1522_s28 = scalar_lea.vmem %s1914_s16, 512 }
 0x455   : > { %v892_v23 = vpop.f32.mrf.mxu0  ;;  %p1523_p0 = scmp.ne.s32.totalorder %s1914_s16, %s1522_s28  ;;  %s1608_s23 = smov [#allocation4]  }
 0x456   : > { %v1353_v26 = vpop.f32.mrf.mxu1  ;;  %s1526_s8 = sshll.u32 %s1608_s23, 4  ;;  %s1527_s8 = int_to_ptr.vmem [resolvable:$false] %s1526_s8 }
 0x457   : > { %933 = vxpose.xlu1.b32.cont [8/16] (narrow) %v1345_v14, 32  ;;  %v958_v29 = vstv %s920_s13  ;;  %p1524_p1 = pnand %p1523_p0, %p1684_p4  ;;  %s1528_s9 = scalar_lea.vmem %s1527_s8, 1024 }
 0x458   : > { %v908_v27 = vpop.f32.mrf.mxu1  ;;  %p1529_p3 = scmp.lt.s32.totalorder %s1914_s16, %s1527_s8  ;;  %p1530_p5 = scmp.lt.s32.totalorder %s1528_s9, %s1522_s28 }
 0x459   : > { %p1525_p2 = pneg %p1524_p1 }
 0x45a   : > { %p1531_p6 = por %p1530_p5, %p1529_p3 }
 0x45b   : > { %934 = vxpose.xlu1.b32.cont [9/16] (narrow) %v889_v21, 32 }
 0x45c   : > { %p1532_p7 = pnand %p1531_p6, %p1525_p2 }
 0x45f   : > { %935 = vxpose.xlu1.b32.cont [10/16] (narrow) %v892_v23, 32 }
 0x463   : > { %936 = vxpose.xlu1.b32.cont [11/16] (narrow) %v1348_v20, 32 }
 0x467   : > { %937 = vxpose.xlu1.b32.cont [12/16] (narrow) %v1349_v22, 32 }
 0x46b   : > { %938 = vxpose.xlu1.b32.cont [13/16] (narrow) %v905_v25, 32 }
 0x46f   : > { %939 = vxpose.xlu1.b32.cont [14/16] (narrow) %v908_v27, 32 }
 0x473   : > { %940 = vxpose.xlu1.b32.cont [15/16] (narrow) %v1352_v24, 32 }
 0x477   : > { %941 = vxpose.xlu1.b32.end [16/16] (narrow) %v1353_v26, 32 }
 0x4b7   : > { %v942_v30 = vpop.trf.xlu1 }
 0x4b8   : > { %v959_v32 = vmul.f32 %v958_v29, %v942_v30 }
 0x4ba   : > { %v963_v33 = vadd.f32 %v959_v32, %v1714_v9 }
 0x4bb   : > { %v943_v28 = vpop.trf.xlu1 }
 0x4bc   : > { %967 = vst [vmem:[%s238_s15] sm:$0xff] %v963_v33  ;;  %v960_v34 = vmul.f32 %v958_v29, %v943_v28 }
 0x4be   : > { %v964_v35 = vadd.f32 %v960_v34, %v1716_v10 }
 0x4bf   : > { %v944_v36 = vpop.trf.xlu1 }
 0x4c0   : > { %968 = vst [vmem:[%s238_s15 + $0x8] sm:$0xff] %v964_v35  ;;  %v961_v37 = vmul.f32 %v958_v29, %v944_v36 }
 0x4c2   : > { %v965_v38 = vadd.f32 %v961_v37, %v1708_v4 }
 0x4c3   : > { %v945_v40 = vpop.trf.xlu1 }
 0x4c4   : > { %969 = vst [vmem:[%s238_s15 + $0x10] sm:$0xff] %v965_v38  ;;  %v962_v9 = vmul.f32 %v958_v29, %v945_v40 }
 0x4c6   : > { %v966_v10 = vadd.f32 %v962_v9, %v1710_v5 }
 0x4c8   : > { %970 = vst [vmem:[%s238_s15 + $0x18] sm:$0xff] %v966_v10 }
 0x4c9   : > { %1535 = shalt.err (!%p1532_p7)
}
 0x4ca   : > { %s1536_s10 = scalar_lea.hbm %s1919_s3, 512  ;;  %s1540_s13 = scalar_lea.hbm %s1971_s4, 1024 }
 0x4cb   : > { %p1537_p9 = scmp.ne.s32.totalorder %s1919_s3, %s1536_s10  ;;  %p1541_p12 = scmp.lt.s32.totalorder %s1919_s3, %s1971_s4 }
 0x4cc   : > { %p1542_p13 = scmp.lt.s32.totalorder %s1540_s13, %s1536_s10 }
 0x4cd   : > { %p1538_p10 = pnand %p1537_p9, %p1684_p4 }
 0x4ce   : > { %p1543_p0 = por %p1542_p13, %p1541_p12 }
 0x4cf   : > { %p1539_p11 = pneg %p1538_p10 }
 0x4d1   : > { %p1544_p1 = pnand %p1543_p0, %p1539_p11 }
 0x4d3   : > { %1547 = shalt.err (!%p1544_p1)
}
 0x4d4   : > { %s1609_s17 = smov 128   ;;  %s1610_s18 = smov 8  }
 0x4d5   : > { %1359 = dma.vmem_to_hbm [thread:$0]  (%p1684_p4), %s1914_s16, 512, %s1919_s3, %s972_s26, %s1609_s17, %s1609_s17, %s1610_s18  }
 0x4d6 PF: > { %p1370_p2 = scmp.ge.s32.totalorder %s1602_s25, 2  ;;  %s1024_s19 = sand.u32 1, %s1582_s20  }
 0x4d7   : > { %s1025_s28 = scalar_lea.sflag [#allocation5], %s1024_s19 }
 0x4d8   : > { %p1364_p3 = pnand %p1370_p2, %p1691_p8 }
 0x4da   : > { %p1365_p5 = pneg %p1364_p3 }
 0x4dc   : > { %1573 = dma.done.wait (%p1365_p5), %s1025_s28, 512  }
 0x4dd   : > { %1575 = vsyncadd (%p1365_p5), %s1025_s28, 4294966784  ;;  %s1034_s23 = scalar_lea.sflag [#allocation7], %s1024_s19 }
 0x4de   : > { %1577 = dma.done.wait (%p1365_p5), %s1034_s23, 1024  }
 0x4df   : > { %1579 = vsyncadd (%p1365_p5), %s1034_s23, 4294966272  ;;  %s23_s25 = sadd.s32 1, %s1602_s25   ;;  %s1975_s20 = smov %s1586_s21 }
 0x4e0   : > { %p20_p6 = scmp.ge.s32.totalorder %s23_s25, 4   ;;  %s1976_s21 = smov %s1590_s22 }
 0x4e1   : > { %s1977_s22 = smov %s1697_s7  ;;  %s1978_s23 = smov %s1598_s24 }
 0x4e2   : > { %s1979_s24 = smov %s1981_s27  ;;  %22 = sbr.rel (!%p20_p6) target bundleno = 8 (0x8), region = 94 }
 0x4e7   :  { %1039 = vsyncpa [#allocation5], 1 }
 0x4e8   :  { %1041 = vsyncpa [#allocation5 + $0x1], 1 }
 0x4e9   :  { %1042 = vsyncpa [#allocation7], 1 }
 0x4ea   :  { %1044 = vsyncpa [#allocation7 + $0x1], 1 }

</bundles_post_ra>
